<compile_context>
chip_gen: v5e
topology: v5e:2x2
jax: 0.10.0
libtpu: 0.0.40
codegen_flags: <defaults>
</compile_context>

<pallas_src>
import numpy as np
import jax
import jax.numpy as jnp
from jax.experimental import pallas as pl
from jax.experimental.pallas import tpu as pltpu


def _channel_attention_kernel(x_ref, w1t_ref, w2t_ref, o_ref):
    """x_ref: (TB, C, HW) native dtype; w1t_ref: (C, Cr); w2t_ref: (Cr, C); o_ref: (TB, C)."""
    f32 = jnp.float32
    x = x_ref[...].astype(f32)                         # upcast in VMEM (v5e VPU has no bf16)
    tb = x.shape[0]

    # Adaptive max / avg pool over all spatial positions (lane-axis reductions).
    mx = jnp.max(x, axis=-1)                           # (TB, C)
    av = jnp.mean(x, axis=-1)                          # (TB, C)  (divides by true HW)
    pooled = jnp.concatenate([mx, av], axis=0)         # (2*TB, C) [max rows ; avg rows]

    # SE layer 1 for ALL pooled vectors of the tile in one matmul.
    hidden = jax.nn.relu(
        jnp.dot(pooled, w1t_ref[...], preferred_element_type=f32))   # (2*TB, Cr)

    # Layer 2 is linear, so se(max)+se(avg) == (relu_max + relu_avg) @ W2^T.
    h = hidden[:tb, :] + hidden[tb:, :]                               # (TB, Cr)
    out = jnp.dot(h, w2t_ref[...], preferred_element_type=f32)        # (TB, C)

    o_ref[...] = jax.nn.sigmoid(out).astype(o_ref.dtype)


def channel_attention_forward(x, w1, w2, *, block_batch=None):
    """x: (N, C, H, W);  w1: (Cr, C) [1x1 conv C->Cr];  w2: (C, Cr) [1x1 conv Cr->C].

    Returns sigmoid(se(maxpool(x)) + se(avgpool(x))) with shape (N, C, 1, 1),
    matching the PyTorch module (output in x.dtype).
    """
    N, C, H, W = x.shape
    Cr = w1.shape[0]
    HW = H * W

    x_flat = x.reshape(N, C, HW)                       # free view, no HBM copy, native dtype

    if block_batch is None:
        # Size the batch tile so one input block is <= ~8 MiB: double-buffered
        # (2x) it stays under the 32 MiB scoped VMEM default on every
        # generation, including v7x's 64 MiB physical VMEM.
        budget_bytes = 8 * 1024 * 1024
        row_bytes = C * HW * jnp.dtype(x.dtype).itemsize
        block_batch = max(1, min(N, budget_bytes // max(row_bytes, 1)))
    TB = int(block_batch)
    grid_n = pl.cdiv(N, TB)

    # Pre-transposed f32 weights (tiny; in real use prepare once, not per call).
    w1t = jnp.asarray(w1, jnp.float32).T               # (C, Cr) == W1^T
    w2t = jnp.asarray(w2, jnp.float32).T               # (Cr, C) == W2^T

    out = pl.pallas_call(
        _channel_attention_kernel,
        out_shape=jax.ShapeDtypeStruct((N, C), x.dtype),
        grid_spec=pltpu.PrefetchScalarGridSpec(
            num_scalar_prefetch=0,
            grid=(grid_n,),
            in_specs=[
                pl.BlockSpec((TB, C, HW), lambda i: (i, 0, 0)),   # streamed batch tile
                pl.BlockSpec((C, Cr), lambda i: (0, 0)),          # resident W1^T
                pl.BlockSpec((Cr, C), lambda i: (0, 0)),          # resident W2^T
            ],
            out_specs=pl.BlockSpec((TB, C), lambda i: (i, 0)),    # (TB, C) block per step
        ),
        compiler_params=pltpu.CompilerParams(
            dimension_semantics=("parallel",)),        # independent batch tiles
    )(x_flat, w1t, w2t)

    # (N, C) -> (N, C, 1, 1): row-major-consistent, free reshape.
    return out.reshape(N, C, 1, 1)


def reference_forward(x, w1, w2):
    """Pure-JAX mirror of the PyTorch ChannelAttention.forward (for verification)."""
    xf = x.astype(jnp.float32)
    mx = jnp.max(xf, axis=(2, 3))        # AdaptiveMaxPool2d(1) -> (N, C)
    av = jnp.mean(xf, axis=(2, 3))       # AdaptiveAvgPool2d(1) -> (N, C)

    w1f = jnp.asarray(w1, jnp.float32)
    w2f = jnp.asarray(w2, jnp.float32)

    def se(v):                           # 1x1 convs on (N,C,1,1) == bias-free linears
        return jax.nn.relu(v @ w1f.T) @ w2f.T

    out = jax.nn.sigmoid(se(mx) + se(av))
    return out.reshape(x.shape[0], x.shape[1], 1, 1).astype(x.dtype)


if __name__ == "__main__":
    key = jax.random.PRNGKey(0)
    kx, k1, k2 = jax.random.split(key, 3)

    N = 4
    channel = 64
    reduction = 16
    Cr = channel // reduction            # 4
    H = W = 16

    x = jax.random.normal(kx, (N, channel, H, W), jnp.float32)
    w1 = jax.random.normal(k1, (Cr, channel), jnp.float32) * 0.1   # Conv2d(C, C//r, 1)
    w2 = jax.random.normal(k2, (channel, Cr), jnp.float32) * 0.1   # Conv2d(C//r, C, 1)

    ref = reference_forward(x, w1, w2)

    # Default tiling (whole batch in one grid step).
    out = channel_attention_forward(x, w1, w2)
    jax.block_until_ready(out)
    np.testing.assert_allclose(np.asarray(out), np.asarray(ref),
                               rtol=1e-5, atol=1e-5)

    # Multi-step grid (batch tile of 2 -> grid=(2,)) exercising the tiling path.
    out_tiled = channel_attention_forward(x, w1, w2, block_batch=2)
    jax.block_until_ready(out_tiled)
    np.testing.assert_allclose(np.asarray(out_tiled), np.asarray(ref),
                               rtol=1e-5, atol=1e-5)

    print("KERNEL_OK")
</pallas_src>

<mosaic_0001>
module attributes {stable_mosaic.version = 11 : i64} {
  func.func @_channel_attention_kernel(%arg0: i32, %arg1: memref<4x64x256xf32, #tpu.memory_space<vmem>>, %arg2: memref<64x4xf32, #tpu.memory_space<vmem>>, %arg3: memref<4x64xf32, #tpu.memory_space<vmem>>, %arg4: memref<4x64xf32, #tpu.memory_space<vmem>>) attributes {dimension_semantics = [#tpu.dimension_semantics<parallel>], iteration_bounds = array<i64: 1>, scalar_prefetch = 0 : i64, scratch_operands = 0 : i64, tpu.core_type = #tpu.core_type<tc>, window_params = [{transform_indices = @transform_0, window_bounds = array<i64: 4, 64, 256>}, {pipeline_mode = #tpu.pipeline_mode<synchronous>, transform_indices = @transform_1, window_bounds = array<i64: 64, 4>}, {pipeline_mode = #tpu.pipeline_mode<synchronous>, transform_indices = @transform_2, window_bounds = array<i64: 4, 64>}, {transform_indices = @transform_3, window_bounds = array<i64: 4, 64>}]} {
    %c0 = arith.constant 0 : index
    %c0_0 = arith.constant 0 : index
    %c0_1 = arith.constant 0 : index
    %0 = vector.load %arg1[%c0, %c0_0, %c0_1] : memref<4x64x256xf32, #tpu.memory_space<vmem>>, vector<4x64x256xf32>
    %cst = arith.constant dense<0xFF800000> : vector<4x64xf32>
    %1 = vector.multi_reduction <maximumf>, %0, %cst [2] : vector<4x64x256xf32> to vector<4x64xf32>
    %cst_2 = arith.constant dense<0.000000e+00> : vector<4x64xf32>
    %2 = vector.multi_reduction <add>, %0, %cst_2 [2] : vector<4x64x256xf32> to vector<4x64xf32>
    %cst_3 = arith.constant 2.560000e+02 : f32
    %3 = vector.broadcast %cst_3 : f32 to vector<4x64xf32>
    %4 = arith.divf %2, %3 : vector<4x64xf32>
    %5 = tpu.concatenate %1, %4 in 0 : vector<4x64xf32>, vector<4x64xf32> -> vector<8x64xf32>
    %c0_4 = arith.constant 0 : index
    %c0_5 = arith.constant 0 : index
    %6 = vector.load %arg2[%c0_4, %c0_5] : memref<64x4xf32, #tpu.memory_space<vmem>>, vector<64x4xf32>
    %cst_6 = arith.constant dense<0.000000e+00> : vector<8x4xf32>
    %7 = tpu.matmul %5, %6, %cst_6 {dimension_numbers = #tpu.dot_dimension_numbers<[1], [0], [0], [1], [0, 0, 1, 1], [], []>} : vector<8x64xf32>, vector<64x4xf32>, vector<8x4xf32> -> vector<8x4xf32>
    %cst_7 = arith.constant 0.000000e+00 : f32
    %8 = vector.broadcast %cst_7 : f32 to vector<8x4xf32>
    %9 = arith.maximumf %7, %8 : vector<8x4xf32>
    %10 = vector.extract_strided_slice %9 {offsets = [0, 0], sizes = [4, 4], strides = [1, 1]} : vector<8x4xf32> to vector<4x4xf32>
    %11 = vector.extract_strided_slice %9 {offsets = [4, 0], sizes = [4, 4], strides = [1, 1]} : vector<8x4xf32> to vector<4x4xf32>
    %12 = arith.addf %10, %11 : vector<4x4xf32>
    %c0_8 = arith.constant 0 : index
    %c0_9 = arith.constant 0 : index
    %13 = vector.load %arg3[%c0_8, %c0_9] : memref<4x64xf32, #tpu.memory_space<vmem>>, vector<4x64xf32>
    %cst_10 = arith.constant dense<0.000000e+00> : vector<4x64xf32>
    %14 = tpu.matmul %12, %13, %cst_10 {dimension_numbers = #tpu.dot_dimension_numbers<[1], [0], [0], [1], [0, 0, 1, 1], [], []>} : vector<4x4xf32>, vector<4x64xf32>, vector<4x64xf32> -> vector<4x64xf32>
    %15 = arith.negf %14 : vector<4x64xf32>
    %16 = math.exp %15 : vector<4x64xf32>
    %cst_11 = arith.constant 1.000000e+00 : f32
    %17 = vector.broadcast %cst_11 : f32 to vector<4x64xf32>
    %18 = arith.addf %17, %16 : vector<4x64xf32>
    %19 = arith.divf %17, %18 : vector<4x64xf32>
    %c0_12 = arith.constant 0 : index
    %c0_13 = arith.constant 0 : index
    %20 = vector.load %arg4[%c0_12, %c0_13] : memref<4x64xf32, #tpu.memory_space<vmem>>, vector<4x64xf32>
    tpu.vector_store %arg4[%c0_12, %c0_13], %19 {strides = array<i32>} : memref<4x64xf32, #tpu.memory_space<vmem>>, vector<4x64xf32>,
    return
  }
  func.func @transform_0(%arg0: i32) -> (i32, i32, i32) {
    %c0_i32 = arith.constant 0 : i32
    %c0_i32_0 = arith.constant 0 : i32
    %c0_i32_1 = arith.constant 0 : i32
    return %arg0, %c0_i32, %c0_i32_0 : i32, i32, i32
  }
  func.func @transform_1(%arg0: i32) -> (i32, i32) {
    %c0_i32 = arith.constant 0 : i32
    %c0_i32_0 = arith.constant 0 : i32
    %c0_i32_1 = arith.constant 0 : i32
    return %c0_i32, %c0_i32_0 : i32, i32
  }
  func.func @transform_2(%arg0: i32) -> (i32, i32) {
    %c0_i32 = arith.constant 0 : i32
    %c0_i32_0 = arith.constant 0 : i32
    %c0_i32_1 = arith.constant 0 : i32
    return %c0_i32, %c0_i32_0 : i32, i32
  }
  func.func @transform_3(%arg0: i32) -> (i32, i32) {
    %c0_i32 = arith.constant 0 : i32
    %c0_i32_0 = arith.constant 0 : i32
    return %arg0, %c0_i32 : i32, i32
  }
}

</mosaic_0001>

<bundles_post_ra>
// kernel: tpu_custom_call.1
= control target key start
LH: loop header
LB: loop body
LE: loop exit
PB: predicated region body
PF: predicated region fallthrough
CT: control target
= control target key end

     0   :  { %8 = vsyncpa [#allocation3], 0  ;;  %s1050_s0 = inlined_call_operand.hbm [shape: f32[4,64,256], index: 0, kind: input, shape index: {}]   ;;  %s1051_s1 = inlined_call_operand.vmem [shape: f32[64,4], index: 1, kind: input, shape index: {}]   ;;  %s1052_s2 = inlined_call_operand.vmem [shape: f32[4,64], index: 2, kind: input, shape index: {}]   ;;  %s1053_s3 = inlined_call_operand.hbm [shape: f32[4,64], index: 3, kind: output, shape index: {}]  }
   0x1   :  { %9 = vsyncpa [#allocation4], 0  ;;  %s14_s14 = sshll.u32 %s1050_s0, 4  ;;  %s712_s15 = smov [#allocation2]   ;;  %s15_s14 = int_to_ptr.hbm [resolvable:$true] %s14_s14 }
   0x2   :  { %s16_s16 = sshll.u32 %s712_s15, 4  ;;  %s713_s17 = smov 256   ;;  %s17_s16 = int_to_ptr.vmem [resolvable:$true] %s16_s16 }
   0x3   :  { %s714_s18 = smov 16  }
   0x4   :  { %22 = dma.hbm_to_vmem [thread:$0]  %s15_s14, 8192, %s17_s16, [#allocation3], %s713_s17, %s713_s17, %s714_s18  }
   0x5   :  { %708 = dma.done.wait [#allocation3], 8192  }
   0x6   :  { %709 = vsyncadd [#allocation3], 4294959104  ;;  %v47_v0 = vld [vmem:[#allocation2 + $0x80] sm:$0xff]  ;;  %v48_v1 = vld [vmem:[#allocation2 + $0x88] sm:$0xff]  ;;  %vm363_vm1 = vcmask 130112   ;;  %vm367_vm2 = vcmask 195712  }
   0x7   :  { %v35_v2 = vld [vmem:[#allocation2 + $0x20] sm:$0xff]  ;;  %v215_v3 = vadd.f32 %v48_v1, %v47_v0  ;;  %v36_v4 = vld [vmem:[#allocation2 + $0x28] sm:$0xff]  ;;  %v49_v9 = vld [vmem:[#allocation2 + $0x90] sm:$0xff]  ;;  %v119_v25 = vmax.f32 %v47_v0, %v48_v1  ;;  %vm371_vm3 = vcmask 261312   ;;  %vm375_vm4 = vcmask 326912   ;;  %s635_s11 = sshll.u32 %s1053_s3, 4  ;;  %s636_s11 = int_to_ptr.hbm [resolvable:$true] %s635_s11 }
   0x8   :  { %v31_v5 = vld [vmem:[#allocation2] sm:$0xff]  ;;  %v32_v6 = vld [vmem:[#allocation2 + $0x8] sm:$0xff]  ;;  %v197_v7 = vadd.f32 %v36_v4, %v35_v2  ;;  %v50_v10 = vld [vmem:[#allocation2 + $0x98] sm:$0xff]  ;;  %v101_v43 = vmax.f32 %v35_v2, %v36_v4  ;;  %vm379_vm5 = vcmask 392512   ;;  %vm383_vm6 = vcmask 458112  }
   0x9   :  { %v191_v8 = vadd.f32 %v32_v6, %v31_v5  ;;  %216 = vadd.xlane.f32.xlu1 %v215_v3  ;;  %v51_v11 = vld [vmem:[#allocation2 + $0xa0] sm:$0xff]  ;;  %v52_v12 = vld [vmem:[#allocation2 + $0xa8] sm:$0xff]  ;;  %v33_v13 = vld [vmem:[#allocation2 + $0x10] sm:$0xff]  ;;  %v218_v15 = vadd.f32 %v50_v10, %v49_v9  ;;  %v95_v24 = vmax.f32 %v31_v5, %v32_v6  ;;  %v122_v27 = vmax.f32 %v49_v9, %v50_v10 }
   0xa   :  { %198 = vadd.xlane.f32.xlu2 %v197_v7  ;;  %v34_v14 = vld [vmem:[#allocation2 + $0x18] sm:$0xff]  ;;  %v221_v16 = vadd.f32 %v52_v12, %v51_v11  ;;  %v65_v18 = vld [vmem:[#allocation2 + $0x110] sm:$0xff]  ;;  %v63_v20 = vld [vmem:[#allocation2 + $0x100] sm:$0xff]  ;;  %v125_v45 = vmax.f32 %v51_v11, %v52_v12  ;;  %vm387_vm7 = vcmask 523712   ;;  %vm533_vm8 = vcmask 1045509  }
   0xb   :  { %192 = vadd.xlane.f32.xlu0 %v191_v8  ;;  %v194_v17 = vadd.f32 %v34_v14, %v33_v13  ;;  %v66_v19 = vld [vmem:[#allocation2 + $0x118] sm:$0xff]  ;;  %v64_v21 = vld [vmem:[#allocation2 + $0x108] sm:$0xff]  ;;  %v98_v26 = vmax.f32 %v33_v13, %v34_v14  ;;  %v53_v28 = vld [vmem:[#allocation2 + $0xb0] sm:$0xff]  ;;  %vm535_vm9 = vcmask 1046534   ;;  %vm434_vm10 = vcmask 1041409  }
   0xc   :  { %v242_v22 = vadd.f32 %v66_v19, %v65_v18  ;;  %v239_v23 = vadd.f32 %v64_v21, %v63_v20  ;;  %v54_v29 = vld [vmem:[#allocation2 + $0xb8] sm:$0xff]  ;;  %v37_v30 = vld [vmem:[#allocation2 + $0x30] sm:$0xff]  ;;  %v67_v32 = vld [vmem:[#allocation2 + $0x120] sm:$0xff]  ;;  %v143_v44 = vmax.f32 %v63_v20, %v64_v21  ;;  %v146_v46 = vmax.f32 %v65_v18, %v66_v19 }
   0xd   :  { %v38_v31 = vld [vmem:[#allocation2 + $0x38] sm:$0xff]  ;;  %v68_v33 = vld [vmem:[#allocation2 + $0x128] sm:$0xff]  ;;  %v224_v34 = vadd.f32 %v54_v29, %v53_v28  ;;  %v81_v37 = vld [vmem:[#allocation2 + $0x190] sm:$0xff]  ;;  %v128_v60 = vmax.f32 %v53_v28, %v54_v29  ;;  %v715_v19 = vmov 256.0   ;;  %vm436_vm11 = vcmask 1042434  }
   0xe   :  { %v200_v35 = vadd.f32 %v38_v31, %v37_v30  ;;  %v245_v36 = vadd.f32 %v68_v33, %v67_v32  ;;  %v82_v38 = vld [vmem:[#allocation2 + $0x198] sm:$0xff]  ;;  %v79_v39 = vld [vmem:[#allocation2 + $0x180] sm:$0xff]  ;;  %v80_v40 = vld [vmem:[#allocation2 + $0x188] sm:$0xff]  ;;  %v104_v58 = vmax.f32 %v37_v30, %v38_v31  ;;  %v149_v62 = vmax.f32 %v67_v32, %v68_v33 }
   0xf   :  { %v266_v41 = vadd.f32 %v82_v38, %v81_v37  ;;  %v263_v42 = vadd.f32 %v80_v40, %v79_v39  ;;  %v55_v47 = vld [vmem:[#allocation2 + $0xc0] sm:$0xff]  ;;  %v56_v48 = vld [vmem:[#allocation2 + $0xc8] sm:$0xff]  ;;  %v69_v51 = vld [vmem:[#allocation2 + $0x130] sm:$0xff]  ;;  %v167_v61 = vmax.f32 %v79_v39, %v80_v40  ;;  %v170_v63 = vmax.f32 %v81_v37, %v82_v38 }
  0x10   :  { %v39_v49 = vld [vmem:[#allocation2 + $0x40] sm:$0xff]  ;;  %v40_v50 = vld [vmem:[#allocation2 + $0x48] sm:$0xff]  ;;  %v70_v52 = vld [vmem:[#allocation2 + $0x138] sm:$0xff]  ;;  %v227_v53 = vadd.f32 %v56_v48, %v55_v47  ;;  %v131_v13 = vmax.f32 %v55_v47, %v56_v48  ;;  %654 = vrcp.f32 %v715_v19  ;;  %vm537_vm12 = vcmask 1047559  }
  0x11   :  { %219 = vadd.xlane.f32.xlu1 %v218_v15  ;;  %v203_v54 = vadd.f32 %v40_v50, %v39_v49  ;;  %v248_v55 = vadd.f32 %v70_v52, %v69_v51  ;;  %v83_v56 = vld [vmem:[#allocation2 + $0x1a0] sm:$0xff]  ;;  %v84_v57 = vld [vmem:[#allocation2 + $0x1a8] sm:$0xff]  ;;  %v57_v0 = vld [vmem:[#allocation2 + $0xd0] sm:$0xff]  ;;  %v107_v11 = vmax.f32 %v39_v49, %v40_v50  ;;  %vm438_vm13 = vcmask 1043459  }
  0x12   :  { %222 = vadd.xlane.f32.xlu2 %v221_v16  ;;  %v269_v59 = vadd.f32 %v84_v57, %v83_v56  ;;  %v58_v1 = vld [vmem:[#allocation2 + $0xd8] sm:$0xff]  ;;  %v41_v2 = vld [vmem:[#allocation2 + $0x50] sm:$0xff]  ;;  %v71_v4 = vld [vmem:[#allocation2 + $0x140] sm:$0xff]  ;;  %v173_v16 = vmax.f32 %v83_v56, %v84_v57  ;;  %vm540_vm14 = vcmask 1043456   ;;  %vm550_vm15 = vcmask 523264  }
  0x13   :  { %195 = vadd.xlane.f32.xlu0 %v194_v17  ;;  %v42_v3 = vld [vmem:[#allocation2 + $0x58] sm:$0xff]  ;;  %v72_v5 = vld [vmem:[#allocation2 + $0x148] sm:$0xff]  ;;  %v230_v6 = vadd.f32 %v58_v1, %v57_v0  ;;  %v85_v9 = vld [vmem:[#allocation2 + $0x1b0] sm:$0xff]  ;;  %v152_v17 = vmax.f32 %v69_v51, %v70_v52  ;;  %v134_v32 = vmax.f32 %v57_v0, %v58_v1 }
  0x14   :  { %v206_v7 = vadd.f32 %v42_v3, %v41_v2  ;;  %v251_v8 = vadd.f32 %v72_v5, %v71_v4  ;;  %v86_v10 = vld [vmem:[#allocation2 + $0x1b8] sm:$0xff]  ;;  %v740_v14 = vld [vmem:[#allocation2 + $0x60] sm:$0xff]  ;;  %v742_v15 = vld [vmem:[#allocation2 + $0x68] sm:$0xff]  ;;  %v110_v33 = vmax.f32 %v41_v2, %v42_v3 }
  0x15   :  { %v272_v12 = vadd.f32 %v86_v10, %v85_v9  ;;  %v209_v18 = vadd.f32 %v742_v15, %v740_v14  ;;  %v746_v20 = vld [vmem:[#allocation2 + $0x150] sm:$0xff]  ;;  %v748_v21 = vld [vmem:[#allocation2 + $0x158] sm:$0xff] }
  0x16   :  { %v766_v37 = vld [vmem:[#allocation2 + $0x78] sm:$0xff]  ;;  %v768_v38 = vld [vmem:[#allocation2 + $0xf0] sm:$0xff] }
  0x17   :  { %v770_v39 = vld [vmem:[#allocation2 + $0xf8] sm:$0xff]  ;;  %v781_v51 = vld [vmem:[#allocation2 + $0x1d0] sm:$0xff] }
  0x18   :  { %v236_v47 = vadd.f32 %v770_v39, %v768_v38  ;;  %v783_v52 = vld [vmem:[#allocation2 + $0x1d8] sm:$0xff] }
  0x19   :  { %243 = vadd.xlane.f32.xlu1 %v242_v22  ;;  %v750_v22 = vld [vmem:[#allocation2 + $0xe0] sm:$0xff]  ;;  %v278_v0 = vadd.f32 %v783_v52, %v781_v51 }
  0x1a   :  { %96 = vmax.xlane.f32.xlu2 %v95_v24  ;;  %v754_v24 = vld [vmem:[#allocation2 + $0x1c0] sm:$0xff] }
  0x1b   :  { %240 = vadd.xlane.f32.xlu0 %v239_v23  ;;  %v752_v23 = vld [vmem:[#allocation2 + $0xe8] sm:$0xff] }
  0x1c   :  { %v233_v28 = vadd.f32 %v752_v23, %v750_v22 }
  0x21   :  { %120 = vmax.xlane.f32.xlu1 %v119_v25  ;;  %v756_v25 = vld [vmem:[#allocation2 + $0x1c8] sm:$0xff] }
  0x22   :  { %123 = vmax.xlane.f32.xlu2 %v122_v27  ;;  %v254_v27 = vadd.f32 %v748_v21, %v746_v20  ;;  %v275_v29 = vadd.f32 %v756_v25, %v754_v24 }
  0x23   :  { %99 = vmax.xlane.f32.xlu0 %v98_v26  ;;  %v655_v26 = vpop.eup %654 }
  0x24   :  { %v288_v30 = vmul.f32 256.0, %v655_v26  ;;  %vm292_vm0 = vweird.f32 %v655_v26 }
  0x26   :  { %v289_v31 = vsub.f32 1.0, %v288_v30 }
  0x29   :  { %225 = vadd.xlane.f32.xlu1 %v224_v34  ;;  %v155_v34 = vmax.f32 %v71_v4, %v72_v5  ;;  %v113_v4 = vmax.f32 %v740_v14, %v742_v15 }
  0x2a   :  { %246 = vadd.xlane.f32.xlu2 %v245_v36  ;;  %v764_v36 = vld [vmem:[#allocation2 + $0x70] sm:$0xff] }
  0x2b   :  { %201 = vadd.xlane.f32.xlu0 %v200_v35  ;;  %v290_v35 = vmul.f32 %v655_v26, %v289_v31  ;;  %v91_v31 = vld [vmem:[#allocation2 + $0x1e0] sm:$0xff] }
  0x2d   :  { %v291_v40 = vadd.f32 %v655_v26, %v290_v35 }
  0x2f   :  { %v776_v48 = vsel %vm292_vm0, %v655_v26, %v291_v40  ;;  %v137_v26 = vmax.f32 %v750_v22, %v752_v23  ;;  %vm580_vm0 = vcmask 31744  }
  0x31   :  { %267 = vadd.xlane.f32.xlu1 %v266_v41 }
  0x32   :  { %102 = vmax.xlane.f32.xlu2 %v101_v43 }
  0x33   :  { %264 = vadd.xlane.f32.xlu0 %v263_v42  ;;  %v358_v42 = vlaneseq }
  0x35   :  { %v778_v49 = vand.u32 127, %v358_v42  ;;  %v116_v42 = vmax.f32 %v764_v36, %v766_v37 }
  0x37   :  { %v793_v56 = vadd.s32 4294967280, %v778_v49 }
  0x39   :  { %144 = vmax.xlane.f32.xlu1 %v143_v44 }
  0x3a   :  { %147 = vmax.xlane.f32.xlu2 %v146_v46  ;;  %v176_v46 = vmax.f32 %v85_v9, %v86_v10 }
  0x3b   :  { %126 = vmax.xlane.f32.xlu0 %v125_v45  ;;  %v212_v45 = vadd.f32 %v766_v37, %v764_v36 }
  0x41   :  { %228 = vadd.xlane.f32.xlu1 %v227_v53  ;;  %v786_v53 = vadd.s32 4294967288, %v778_v49 }
  0x42   :  { %249 = vadd.xlane.f32.xlu2 %v248_v55  ;;  %v790_v55 = vld [vmem:[#allocation2 + $0x168] sm:$0xff] }
  0x43   :  { %204 = vadd.xlane.f32.xlu0 %v203_v54  ;;  %v788_v54 = vld [vmem:[#allocation2 + $0x160] sm:$0xff] }
  0x44   :  { %v257_v3 = vadd.f32 %v790_v55, %v788_v54 }
  0x49   :  { %105 = vmax.xlane.f32.xlu1 %v104_v58 }
  0x4a   :  { %129 = vmax.xlane.f32.xlu2 %v128_v60 }
  0x4b   :  { %270 = vadd.xlane.f32.xlu0 %v269_v59 }
  0x51   :  { %168 = vmax.xlane.f32.xlu1 %v167_v61 }
  0x52   :  { %171 = vmax.xlane.f32.xlu2 %v170_v63 }
  0x53   :  { %150 = vmax.xlane.f32.xlu0 %v149_v62 }
  0x59   :  { %231 = vadd.xlane.f32.xlu1 %v230_v6 }
  0x5a   :  { %252 = vadd.xlane.f32.xlu2 %v251_v8 }
  0x5b   :  { %207 = vadd.xlane.f32.xlu0 %v206_v7 }
  0x61   :  { %108 = vmax.xlane.f32.xlu1 %v107_v11 }
  0x62   :  { %132 = vmax.xlane.f32.xlu2 %v131_v13 }
  0x63   :  { %273 = vadd.xlane.f32.xlu0 %v272_v12 }
  0x69   :  { %174 = vmax.xlane.f32.xlu1 %v173_v16 }
  0x6a   :  { %210 = vadd.xlane.f32.xlu2 %v209_v18  ;;  %v158_v18 = vmax.f32 %v746_v20, %v748_v21  ;;  %v77_v20 = vld [vmem:[#allocation2 + $0x170] sm:$0xff]  ;;  %v78_v21 = vld [vmem:[#allocation2 + $0x178] sm:$0xff] }
  0x6b   :  { %153 = vmax.xlane.f32.xlu0 %v152_v17 }
  0x71   :  { %255 = vadd.xlane.f32.xlu1 %v254_v27  ;;  %v179_v27 = vmax.f32 %v754_v24, %v756_v25 }
  0x72   :  { %276 = vadd.xlane.f32.xlu2 %v275_v29 }
  0x73   :  { %234 = vadd.xlane.f32.xlu0 %v233_v28 }
  0x79   :  { %135 = vmax.xlane.f32.xlu1 %v134_v32  ;;  %v92_v32 = vld [vmem:[#allocation2 + $0x1e8] sm:$0xff] }
  0x7a   :  { %156 = vmax.xlane.f32.xlu2 %v155_v34  ;;  %v281_v25 = vadd.f32 %v92_v32, %v91_v31 }
  0x7b   :  { %111 = vmax.xlane.f32.xlu0 %v110_v33 }
  0x7c   :  { %v217_v41 = vpop.xlane.xlu1 %216 }
  0x7d   :  { %v199_v43 = vpop.xlane.xlu2 %198  ;;  %v302_v50 = vmul.f32 %v776_v48, %v217_v41  ;;  %v260_v41 = vadd.f32 %v78_v21, %v77_v20 }
  0x7e   :  { %v193_v44 = vpop.xlane.xlu0 %192  ;;  %v296_v60 = vmul.f32 %v776_v48, %v199_v43 }
  0x7f   :  { %v294_v57 = vmul.f32 %v776_v48, %v193_v44  ;;  %v488_v59 = vperm.slane %v302_v50, %v778_v49 }
  0x80   :  { %v476_v9 = vperm.slane %v296_v60, %v793_v56  ;;  %v182_v60 = vmax.f32 %v781_v51, %v783_v52 }
  0x81   :  { %213 = vadd.xlane.f32.xlu1 %v212_v45  ;;  %v473_v6 = vperm.slane %v294_v57, %v778_v49  ;;  %v836_v45 = vadd.s32 4294967272, %v778_v49 }
  0x82   :  { %237 = vadd.xlane.f32.xlu2 %v236_v47 }
  0x83   :  { %177 = vmax.xlane.f32.xlu0 %v176_v46 }
  0x84   :  { %v220_v58 = vpop.xlane.xlu1 %219 }
  0x85   :  { %v303_v61 = vmul.f32 %v776_v48, %v220_v58  ;;  %v223_v62 = vpop.xlane.xlu2 %222  ;;  %v161_v58 = vmax.f32 %v788_v54, %v790_v55 }
  0x86   :  { %v196_v63 = vpop.xlane.xlu0 %195  ;;  %v304_v1 = vmul.f32 %v776_v48, %v223_v62 }
  0x87   :  { %v295_v2 = vmul.f32 %v776_v48, %v196_v63  ;;  %v489_v5 = vperm.slane %v303_v61, %v786_v53 }
  0x88   :  { %v491_v7 = vperm.slane %v304_v1, %v793_v56  ;;  %v93_v1 = vld [vmem:[#allocation2 + $0x1f0] sm:$0xff] }
  0x89   :  { %v474_v8 = vperm.slane %v295_v2, %v786_v53  ;;  %v490_v10 = vsel %vm363_vm1, %v489_v5, %v488_v59  ;;  %279 = vadd.xlane.f32.xlu1 %v278_v0  ;;  %v140_v59 = vmax.f32 %v768_v38, %v770_v39  ;;  %v94_v38 = vld [vmem:[#allocation2 + $0x1f8] sm:$0xff] }
  0x8a   :  { %v492_v11 = vsel %vm367_vm2, %v491_v7, %v490_v10  ;;  %114 = vmax.xlane.f32.xlu2 %v113_v4  ;;  %v185_v7 = vmax.f32 %v91_v31, %v92_v32 }
  0x8b   :  { %v475_v12 = vsel %vm363_vm1, %v474_v8, %v473_v6  ;;  %258 = vadd.xlane.f32.xlu0 %v257_v3  ;;  %v164_v3 = vmax.f32 %v77_v20, %v78_v21  ;;  %v284_v6 = vadd.f32 %v94_v38, %v93_v1 }
  0x8c   :  { %v477_v13 = vsel %vm367_vm2, %v476_v9, %v475_v12  ;;  %v244_v14 = vpop.xlane.xlu1 %243 }
  0x8d   :  { %v311_v15 = vmul.f32 %v776_v48, %v244_v14  ;;  %v97_v17 = vpop.xlane.xlu2 %96 }
  0x8e   :  { %v241_v16 = vpop.xlane.xlu0 %240  ;;  %v360_v33 = vperm.slane %v97_v17, %v778_v49 }
  0x8f   :  { %v310_v19 = vmul.f32 %v776_v48, %v241_v16  ;;  %v504_v28 = vperm.slane %v311_v15, %v786_v53 }
  0x91   :  { %v503_v29 = vperm.slane %v310_v19, %v778_v49  ;;  %159 = vmax.xlane.f32.xlu1 %v158_v18  ;;  %v188_v18 = vmax.f32 %v93_v1, %v94_v38 }
  0x92   :  { %180 = vmax.xlane.f32.xlu2 %v179_v27  ;;  %v866_v27 = vadd.s32 4294967264, %v778_v49 }
  0x93   :  { %v505_v30 = vsel %vm363_vm1, %v504_v28, %v503_v29  ;;  %138 = vmax.xlane.f32.xlu0 %v137_v26 }
  0x94   :  { %v121_v34 = vpop.xlane.xlu1 %120 }
  0x95   :  { %v389_v22 = vperm.slane %v121_v34, %v778_v49  ;;  %v124_v24 = vpop.xlane.xlu2 %123 }
  0x96   :  { %v100_v23 = vpop.xlane.xlu0 %99  ;;  %v390_v40 = vperm.slane %v124_v24, %v786_v53 }
  0x97   :  { %v362_v35 = vperm.slane %v100_v23, %v786_v53 }
  0x98   :  { %v391_v44 = vsel %vm363_vm1, %v390_v40, %v389_v22 }
  0x99   :  { %v364_v43 = vsel %vm363_vm1, %v362_v35, %v360_v33  ;;  %282 = vadd.xlane.f32.xlu1 %v281_v25 }
  0x9a   :  { %117 = vmax.xlane.f32.xlu2 %v116_v42 }
  0x9b   :  { %261 = vadd.xlane.f32.xlu0 %v260_v41 }
  0x9c   :  { %v226_v46 = vpop.xlane.xlu1 %225 }
  0x9d   :  { %v305_v47 = vmul.f32 %v776_v48, %v226_v46  ;;  %v247_v57 = vpop.xlane.xlu2 %246 }
  0x9e   :  { %v202_v50 = vpop.xlane.xlu0 %201  ;;  %v312_v37 = vmul.f32 %v776_v48, %v247_v57 }
  0x9f   :  { %v297_v36 = vmul.f32 %v776_v48, %v202_v50  ;;  %v493_v61 = vperm.slane %v305_v47, %v836_v45 }
  0xa0   :  { %v506_v63 = vperm.slane %v312_v37, %v793_v56 }
  0xa1   :  { %v478_v62 = vperm.slane %v297_v36, %v836_v45  ;;  %v494_v0 = vsel %vm371_vm3, %v493_v61, %v492_v11  ;;  %162 = vmax.xlane.f32.xlu1 %v161_v58 }
  0xa2   :  { %v507_v55 = vsel %vm367_vm2, %v506_v63, %v505_v30  ;;  %183 = vmax.xlane.f32.xlu2 %v182_v60  ;;  %v892_v63 = vadd.s32 4294967256, %v778_v49 }
  0xa3   :  { %v479_v54 = vsel %vm371_vm3, %v478_v62, %v477_v13  ;;  %141 = vmax.xlane.f32.xlu0 %v140_v59 }
  0xa4   :  { %v268_v39 = vpop.xlane.xlu1 %267 }
  0xa5   :  { %v319_v51 = vmul.f32 %v776_v48, %v268_v39  ;;  %v103_v2 = vpop.xlane.xlu2 %102 }
  0xa6   :  { %v265_v52 = vpop.xlane.xlu0 %264  ;;  %v366_v5 = vperm.slane %v103_v2, %v793_v56 }
  0xa7   :  { %v318_v4 = vmul.f32 %v776_v48, %v265_v52  ;;  %v519_v8 = vperm.slane %v319_v51, %v786_v53 }
  0xa8   :  { %v368_v10 = vsel %vm367_vm2, %v366_v5, %v364_v43 }
  0xa9   :  { %v518_v9 = vperm.slane %v318_v4, %v778_v49  ;;  %165 = vmax.xlane.f32.xlu1 %v164_v3 }
  0xaa   :  { %186 = vmax.xlane.f32.xlu2 %v185_v7 }
  0xab   :  { %v520_v11 = vsel %vm363_vm1, %v519_v8, %v518_v9  ;;  %285 = vadd.xlane.f32.xlu0 %v284_v6 }
  0xac   :  { %v145_v12 = vpop.xlane.xlu1 %144 }
  0xad   :  { %v404_v13 = vperm.slane %v145_v12, %v778_v49  ;;  %v148_v15 = vpop.xlane.xlu2 %147 }
  0xae   :  { %v127_v14 = vpop.xlane.xlu0 %126  ;;  %v405_v17 = vperm.slane %v148_v15, %v786_v53 }
  0xaf   :  { %v392_v16 = vperm.slane %v127_v14, %v793_v56 }
  0xb0   :  { %v406_v26 = vsel %vm363_vm1, %v405_v17, %v404_v13 }
  0xb1   :  { %v393_v19 = vsel %vm367_vm2, %v392_v16, %v391_v44 }
  0xb3   :  { %189 = vmax.xlane.f32.xlu0 %v188_v18 }
  0xb4   :  { %v229_v28 = vpop.xlane.xlu1 %228 }
  0xb5   :  { %v306_v29 = vmul.f32 %v776_v48, %v229_v28  ;;  %v250_v31 = vpop.xlane.xlu2 %249 }
  0xb6   :  { %v205_v30 = vpop.xlane.xlu0 %204  ;;  %v313_v20 = vmul.f32 %v776_v48, %v250_v31 }
  0xb7   :  { %v298_v32 = vmul.f32 %v776_v48, %v205_v30  ;;  %v495_v21 = vperm.slane %v306_v29, %v866_v27 }
  0xb8   :  { %v508_v34 = vperm.slane %v313_v20, %v836_v45  ;;  %v933_v20 = vadd.s32 4294967248, %v778_v49 }
  0xb9   :  { %v480_v33 = vperm.slane %v298_v32, %v866_v27  ;;  %v496_v22 = vsel %vm375_vm4, %v495_v21, %v494_v0 }
  0xba   :  { %v509_v24 = vsel %vm371_vm3, %v508_v34, %v507_v55  ;;  %v938_v34 = vadd.s32 4294967240, %v778_v49 }
  0xbb   :  { %v481_v23 = vsel %vm375_vm4, %v480_v33, %v479_v54 }
  0xbc   :  { %v106_v25 = vpop.xlane.xlu1 %105 }
  0xbd   :  { %v370_v35 = vperm.slane %v106_v25, %v836_v45  ;;  %v130_v41 = vpop.xlane.xlu2 %129 }
  0xbe   :  { %v271_v40 = vpop.xlane.xlu0 %270  ;;  %v394_v43 = vperm.slane %v130_v41, %v836_v45 }
  0xbf   :  { %v320_v42 = vmul.f32 %v776_v48, %v271_v40  ;;  %v372_v44 = vsel %vm371_vm3, %v370_v35, %v368_v10 }
  0xc0   :  { %v395_v47 = vsel %vm371_vm3, %v394_v43, %v393_v19 }
  0xc1   :  { %v521_v46 = vperm.slane %v320_v42, %v793_v56 }
  0xc3   :  { %v522_v50 = vsel %vm367_vm2, %v521_v46, %v520_v11 }
  0xc4   :  { %v169_v57 = vpop.xlane.xlu1 %168 }
  0xc5   :  { %v419_v58 = vperm.slane %v169_v57, %v778_v49  ;;  %v172_v37 = vpop.xlane.xlu2 %171 }
  0xc6   :  { %v151_v36 = vpop.xlane.xlu0 %150  ;;  %v420_v60 = vperm.slane %v172_v37, %v786_v53 }
  0xc7   :  { %v407_v59 = vperm.slane %v151_v36, %v793_v56 }
  0xc8   :  { %v889_v62 = vsel %vm363_vm1, %v420_v60, %v419_v58  ;;  %v547_v60 = vld [vmem:[%s1051_s1 + $0x28] sm:$0xff] }
  0xc9   :  { %v408_v61 = vsel %vm367_vm2, %v407_v59, %v406_v26  ;;  %v548_v59 = vld [vmem:[%s1051_s1 + $0x30] sm:$0xff] }
  0xcc   :  { %v232_v0 = vpop.xlane.xlu1 %231 }
  0xcd   :  { %v307_v54 = vmul.f32 %v776_v48, %v232_v0  ;;  %v253_v1 = vpop.xlane.xlu2 %252  ;;  %v545_v0 = vld [vmem:[%s1051_s1 + $0x18] sm:$0xff] }
  0xce   :  { %v208_v55 = vpop.xlane.xlu0 %207  ;;  %v314_v39 = vmul.f32 %v776_v48, %v253_v1 }
  0xcf   :  { %v299_v38 = vmul.f32 %v776_v48, %v208_v55  ;;  %v497_v53 = vperm.slane %v307_v54, %v892_v63 }
  0xd0   :  { %v510_v52 = vperm.slane %v314_v39, %v866_v27  ;;  %v543_v39 = vld [vmem:[%s1051_s1 + $0x8] sm:$0xff] }
  0xd1   :  { %v482_v51 = vperm.slane %v299_v38, %v892_v63  ;;  %v498_v2 = vsel %vm379_vm5, %v497_v53, %v496_v22  ;;  %v544_v38 = vld [vmem:[%s1051_s1 + $0x10] sm:$0xff] }
  0xd2   :  { %v903_v4 = vsel %vm375_vm4, %v510_v52, %v509_v24 }
  0xd3   :  { %v483_v3 = vsel %vm379_vm5, %v482_v51, %v481_v23  ;;  %v542_v51 = vld [vmem:[%s1051_s1] sm:$0xff] }
  0xd4   :  { %v109_v5 = vpop.xlane.xlu1 %108 }
  0xd5   :  { %v374_v6 = vperm.slane %v109_v5, %v866_v27  ;;  %v133_v8 = vpop.xlane.xlu2 %132 }
  0xd6   :  { %v274_v7 = vpop.xlane.xlu0 %273  ;;  %v396_v10 = vperm.slane %v133_v8, %v866_v27 }
  0xd7   :  { %v321_v9 = vmul.f32 %v776_v48, %v274_v7  ;;  %v909_v11 = vsel %vm375_vm4, %v374_v6, %v372_v44 }
  0xd8   :  { %v913_v13 = vsel %vm375_vm4, %v396_v10, %v395_v47  ;;  %v549_v47 = vld [vmem:[%s1051_s1 + $0x38] sm:$0xff] }
  0xd9   :  { %v523_v12 = vperm.slane %v321_v9, %v836_v45  ;;  %562 = vmatpush.msra.mxu0 %v549_v47 }
  0xdb   :  { %v916_v14 = vsel %vm371_vm3, %v523_v12, %v522_v50  ;;  %563 = vmatpush.msra.mxu0 %v548_v59 }
  0xdc   :  { %v918_v15 = vpop.xlane.xlu1 %174 }
  0xdd   :  { %v211_v17 = vpop.xlane.xlu2 %210  ;;  %564 = vmatpush.msra.mxu0 %v547_v60 }
  0xde   :  { %v154_v16 = vpop.xlane.xlu0 %153  ;;  %v300_v21 = vmul.f32 %v776_v48, %v211_v17 }
  0xdf   :  { %v409_v18 = vperm.slane %v154_v16, %v836_v45 }
  0xe0   :  { %v484_v22 = vperm.slane %v300_v21, %v933_v20 }
  0xe1   :  { %v922_v19 = vsel %vm371_vm3, %v409_v18, %v408_v61  ;;  %v546_v61 = vld [vmem:[%s1051_s1 + $0x20] sm:$0xff] }
  0xe2   :  { %v485_v43 = vsel %vm383_vm6, %v484_v22, %v483_v3  ;;  %565 = vmatpush.msra.mxu0 %v546_v61 }
  0xe4   :  { %v256_v26 = vpop.xlane.xlu1 %255  ;;  %566 = vmatpush.msra.mxu0 %v545_v0  ;;  %v422_v0 = vperm.slane %v918_v15, %v793_v56 }
  0xe5   :  { %v924_v29 = vpop.xlane.xlu2 %276  ;;  %v315_v53 = vmul.f32 %v776_v48, %v256_v26 }
  0xe6   :  { %v235_v28 = vpop.xlane.xlu0 %234  ;;  %567 = vmatpush.msra.mxu0 %v544_v38 }
  0xe7   :  { %v308_v33 = vmul.f32 %v776_v48, %v235_v28 }
  0xe8   :  { %568 = vmatpush.msra.mxu0 %v543_v39 }
  0xe9   :  { %v499_v24 = vperm.slane %v308_v33, %v933_v20 }
  0xea   :  { %569 = vmatpush.msra.mxu0 %v542_v51 }
  0xeb   :  { %v500_v44 = vsel %vm383_vm6, %v499_v24, %v498_v2  ;;  %v512_v2 = vperm.slane %v315_v53, %v892_v63 }
  0xec   :  { %v926_v30 = vpop.xlane.xlu1 %135 }
  0xed   :  { %v930_v32 = vpop.xlane.xlu2 %156  ;;  %v513_v9 = vsel %vm379_vm5, %v512_v2, %v903_v4  ;;  %v398_v16 = vperm.slane %v926_v30, %v892_v63 }
  0xee   :  { %v928_v31 = vpop.xlane.xlu0 %111 }
  0xef   :  { %v378_v17 = vperm.slane %v928_v31, %v892_v63 }
  0xf1   :  { %v380_v30 = vsel %vm379_vm5, %v378_v17, %v909_v11 }
  0xf4   :  { %v214_v23 = vpop.xlane.xlu1 %213 }
  0xf5   :  { %v301_v25 = vmul.f32 %v776_v48, %v214_v23  ;;  %v238_v40 = vpop.xlane.xlu2 %237  ;;  %v399_v23 = vsel %vm379_vm5, %v398_v16, %v913_v13 }
  0xf6   :  { %v943_v35 = vpop.xlane.xlu0 %177  ;;  %v309_v41 = vmul.f32 %v776_v48, %v238_v40 }
  0xf7   :  { %v486_v42 = vperm.slane %v301_v25, %v938_v34  ;;  %v322_v25 = vmul.f32 %v776_v48, %v924_v29 }
  0xf8   :  { %v501_v49 = vperm.slane %v309_v41, %v938_v34 }
  0xf9   :  { %v487_v46 = vsel %vm387_vm7, %v486_v42, %v485_v43  ;;  %v411_v42 = vperm.slane %v930_v32, %v866_v27  ;;  %v525_v47 = vperm.slane %v322_v25, %v866_v27 }
  0xfa   :  { %v502_v50 = vsel %vm387_vm7, %v501_v49, %v500_v44 }
  0xfb   :  { %v534_v57 = vsel %vm533_vm8, %v502_v50, %v487_v46  ;;  %v412_v50 = vsel %vm375_vm4, %v411_v42, %v922_v19  ;;  %v526_v19 = vsel %vm375_vm4, %v525_v47, %v916_v14 }
  0xfc   :  { %v280_v58 = vpop.xlane.xlu1 %279 }
  0xfd   :  { %v115_v37 = vpop.xlane.xlu2 %114  ;;  %v323_v43 = vmul.f32 %v776_v48, %v280_v58 }
  0xfe   :  { %v259_v36 = vpop.xlane.xlu0 %258  ;;  %v382_v26 = vperm.slane %v115_v37, %v933_v20 }
  0xff   :  { %v316_v52 = vmul.f32 %v776_v48, %v259_v36  ;;  %v527_v32 = vperm.slane %v323_v43, %v892_v63 }
 0x100   :  { %v384_v40 = vsel %vm383_vm6, %v382_v26, %v380_v30 }
 0x101   :  { %v514_v5 = vperm.slane %v316_v52, %v933_v20  ;;  %v528_v38 = vsel %vm379_vm5, %v527_v32, %v526_v19 }
 0x103   :  { %v515_v12 = vsel %vm383_vm6, %v514_v5, %v513_v9 }
 0x104   :  { %v160_v54 = vpop.xlane.xlu1 %159 }
 0x105   :  { %v967_v1 = vpop.xlane.xlu2 %180  ;;  %v413_v49 = vperm.slane %v160_v54, %v892_v63  ;;  %v424_v54 = vperm.slane %v943_v35, %v836_v45  ;;  %v423_v45 = vsel %vm367_vm2, %v422_v0, %v889_v62 }
 0x106   :  { %v139_v55 = vpop.xlane.xlu0 %138 }
 0x107   :  { %v400_v28 = vperm.slane %v139_v55, %v933_v20  ;;  %v414_v58 = vsel %vm379_vm5, %v413_v49, %v412_v50  ;;  %v425_v2 = vsel %vm371_vm3, %v424_v54, %v423_v45 }
 0x109   :  { %v401_v41 = vsel %vm383_vm6, %v400_v28, %v399_v23 }
 0x10c   :  { %v283_v3 = vpop.xlane.xlu1 %282 }
 0x10d   :  { %v118_v7 = vpop.xlane.xlu2 %117  ;;  %v324_v44 = vmul.f32 %v776_v48, %v283_v3 }
 0x10e   :  { %v262_v6 = vpop.xlane.xlu0 %261  ;;  %v386_v4 = vperm.slane %v118_v7, %v938_v34 }
 0x10f   :  { %v317_v8 = vmul.f32 %v776_v48, %v262_v6  ;;  %v529_v36 = vperm.slane %v324_v44, %v933_v20 }
 0x110   :  { %v388_v13 = vsel %vm387_vm7, %v386_v4, %v384_v40 }
 0x111   :  { %v516_v10 = vperm.slane %v317_v8, %v938_v34  ;;  %v530_v56 = vsel %vm383_vm6, %v529_v36, %v528_v38 }
 0x113   :  { %v517_v18 = vsel %vm387_vm7, %v516_v10, %v515_v12 }
 0x114   :  { %v536_v21 = vsel %vm535_vm9, %v517_v18, %v534_v57  ;;  %v163_v33 = vpop.xlane.xlu1 %162 }
 0x115   :  { %v184_v24 = vpop.xlane.xlu2 %183  ;;  %v415_v29 = vperm.slane %v163_v33, %v933_v20 }
 0x116   :  { %v142_v22 = vpop.xlane.xlu0 %141  ;;  %v428_v15 = vperm.slane %v184_v24, %v892_v63 }
 0x117   :  { %v402_v31 = vperm.slane %v142_v22, %v938_v34  ;;  %v416_v60 = vsel %vm383_vm6, %v415_v29, %v414_v58 }
 0x119   :  { %v403_v11 = vsel %vm387_vm7, %v402_v31, %v401_v41 }
 0x11a   :  { %v435_v46 = vsel %vm434_vm10, %v403_v11, %v388_v13 }
 0x11c   :  { %v166_v57 = vpop.xlane.xlu1 %165 }
 0x11d   :  { %v417_v37 = vperm.slane %v166_v57, %v938_v34  ;;  %v187_v53 = vpop.xlane.xlu2 %186 }
 0x11e   :  { %v286_v59 = vpop.xlane.xlu0 %285  ;;  %v430_v35 = vperm.slane %v187_v53, %v933_v20  ;;  %v579_v20 = vld [vmem:[%s1052_s2] sm:$0xf]  ;;  %s716_s2 = smov [#allocation5]  }
 0x11f   :  { %v325_v61 = vmul.f32 %v776_v48, %v286_v59  ;;  %v418_v55 = vsel %vm387_vm7, %v417_v37, %v416_v60  ;;  %v426_v48 = vperm.slane %v967_v1, %v866_v27  ;;  %646 = vmatpush.msk.msra.mxu1 %vm540_vm14, %v579_v20  ;;  %s633_s8 = sshll.u32 %s716_s2, 4  ;;  %s634_s8 = int_to_ptr.vmem [resolvable:$true] %s633_s8 }
 0x120   :  { %v437_v51 = vsel %vm436_vm11, %v418_v55, %v435_v46 }
 0x121   :  { %v531_v39 = vperm.slane %v325_v61, %v938_v34  ;;  %v427_v3 = vsel %vm375_vm4, %v426_v48, %v425_v2  ;;  %vm626_vm4 = vcmask 519168  }
 0x122   :  { %v429_v6 = vsel %vm379_vm5, %v428_v15, %v427_v3 }
 0x123   :  { %v532_v14 = vsel %vm387_vm7, %v531_v39, %v530_v56  ;;  %v431_v63 = vsel %vm383_vm6, %v430_v35, %v429_v6 }
 0x124   :  { %v538_v52 = vsel %vm537_vm12, %v532_v14, %v536_v21 }
 0x126   :  { %v190_v5 = vpop.xlane.xlu0 %189 }
 0x127   :  { %v432_v27 = vperm.slane %v190_v5, %v938_v34 }
 0x129   :  { %v433_v1 = vsel %vm387_vm7, %v432_v27, %v431_v63 }
 0x12a   :  { %v439_v62 = vsel %vm438_vm13, %v433_v1, %v437_v51 }
 0x12b   :  { %v541_v7 = vsel %vm540_vm14, %v439_v62, %v538_v52 }
 0x12c   :  { %645 = vmatmul.msk.f32.vlgmr.msra.gmra.mxu0 %vm550_vm15, %v541_v7 }
 0x1a9   :  { %v571_v8 = vpop.f32.mrf.mxu0 }
 0x1aa   :  { %v574_v9 = vmax.f32 %v571_v8, 0.0 }
 0x1ac   :  { %v576_v10 = vrot.slane %v574_v9, 4 }
 0x1ae   :  { %v578_v34 = vadd.f32 %v576_v10, %v574_v9 }
 0x1b0   :  { %647 = vmatmul.msk.f32.vlgmr.msra.gmra.mxu1 %vm580_vm0, %v578_v34 }
 0x22d   :  { %v604_v12 = vpop.f32.mrf.mxu1 }
 0x22e   :  { %v648_v16 = vmul.f32 -1.442695, %v604_v12 }
 0x230   :  { %656 = vpow2.f32 %v648_v16 }
 0x236   :  { %v657_v17 = vpop.eup %656 }
 0x237   :  { %v610_v18 = vadd.f32 1.0, %v657_v17 }
 0x239   :  { %658 = vrcp.f32 %v610_v18  ;;  %v622_v4 = vand.u32 2147483648, %v610_v18  ;;  %v620_v22 = vand.u32 2147483647, %v610_v18  ;;  %vm616_vm2 = vweird.f32 %v610_v18 }
 0x23b   :  { %v623_v30 = vor.u32 1.1754944e-38, %v622_v4  ;;  %vm621_vm5 = vcmp.eq.f32.partialorder %v620_v22, 8.507059e+37 }
 0x23f   :  { %v659_v26 = vpop.eup %658 }
 0x240   :  { %v612_v28 = vmul.f32 %v659_v26, %v610_v18  ;;  %vm617_vm1 = vweird.f32 %v659_v26 }
 0x241   :  { %vm618_vm3 = vmor %vm616_vm2, %vm617_vm1 }
 0x242   :  { %v613_v21 = vsub.f32 1.0, %v612_v28 }
 0x244   :  { %v614_v33 = vmul.f32 %v659_v26, %v613_v21 }
 0x246   :  { %v615_v23 = vadd.f32 %v659_v26, %v614_v33 }
 0x248   :  { %v619_v31 = vsel %vm618_vm3, %v659_v26, %v615_v23 }
 0x249   :  { %v624_v24 = vsel %vm621_vm5, %v623_v30, %v619_v31 }
 0x24a   :  { %627 = vst.msk [vmem:[#allocation5] sm:$0xf] %vm626_vm4, %v624_v24 }
 0x24b   :  { %638 = dma.vmem_to_hbm [thread:$0]  %s634_s8, 64, %s636_s11, [#allocation4]  }
 0x24c   :  { %710 = dma.done.wait [#allocation4], 64  }
 0x24d   :  { %711 = vsyncadd [#allocation4], 4294967232 }
 0x24e   :  { %643 = vsyncpa [#allocation3], 1 }
 0x24f   :  { %644 = vsyncpa [#allocation4], 1 }

</bundles_post_ra>
